<compile_context>
chip_gen: v7x
topology: tpu7x:2x2x1
jax: 0.10.0
libtpu: 0.0.40
codegen_flags: <defaults>
</compile_context>

<pallas_src>
import functools

import jax
import jax.numpy as jnp
from jax.experimental import pallas as pl
from jax.experimental.pallas import tpu as pltpu

_LANE = 128


def _round_up(x, m):
    return ((x + m - 1) // m) * m


def _proj_kernel(xp_ref, w_ref, b_ref, o_ref, *, precision=None):
    # xp_ref: (tm, Kp)  patch rows        (compute dtype, streamed over M)
    # w_ref : (Kp, tn)  flattened conv W  (compute dtype, resident when tn==Np)
    # b_ref : (1,  tn)  bias              (f32)
    # o_ref : (tm, tn)  output tile       (out dtype)
    acc = jnp.dot(xp_ref[...], w_ref[...],
                  preferred_element_type=jnp.float32, precision=precision)
    o_ref[...] = (acc + b_ref[...]).astype(o_ref.dtype)


def patch_embed_forward(x, weight, bias, patch_size, *,
                        compute_dtype=jnp.bfloat16,
                        out_dtype=None,
                        precision=None,
                        max_tile_m=None,
                        max_tile_n=None):
    """ViT patch embedding (stride == kernel conv) as one Pallas matmul.

    x: (B, C, H, W) NCHW, weight: (E, C, ph, pw), bias: (E,).
    Returns (B, num_patches, E) in `out_dtype` (default: x.dtype).

    compute_dtype: MXU feed dtype (default bf16; accumulation stays f32).
    precision: optional lax.Precision threaded into jnp.dot — pass
        Precision.HIGHEST with compute_dtype=f32 if exact-f32 parity with a
        HIGHEST-precision conv is required.
    max_tile_m / max_tile_n: optional caps (mostly for testing); by default
        tiles are sized from the per-generation VMEM budget.
    """
    if isinstance(patch_size, int):
        patch_size = (patch_size, patch_size)
    B, C, H, W = x.shape
    E = weight.shape[0]
    ph, pw = patch_size
    assert H % ph == 0 and W % pw == 0, "image size must be divisible by patch size"
    gh, gw = H // ph, W // pw
    num_patches = gh * gw

    if out_dtype is None:
        out_dtype = x.dtype
    if compute_dtype is None:
        compute_dtype = x.dtype
    b_in = jnp.dtype(compute_dtype).itemsize
    b_out = jnp.dtype(out_dtype).itemsize

    M = B * num_patches            # number of patches (rows)
    K = C * ph * pw                # reduction dim, flattened (c, kh, kw)

    # ---- VMEM budget (generation aware) -------------------------------------
    try:
        vmem_phys = int(pltpu.get_tpu_info().vmem_capacity_bytes)
    except Exception:  # no device / old API -> v7x-conservative fallback
        vmem_phys = 64 * 1024 * 1024
    budget = min(vmem_phys * 3 // 4, 96 * 1024 * 1024)   # 48 MiB on v7x, 96 MiB on v5e/v6e
    usable = budget - 2 * 1024 * 1024                     # headroom for Mosaic scratch

    # ---- padding -------------------------------------------------------------
    # K: keep full extent for small K (legal block shape, avoids inflating the
    # dominant HBM read of xp); 128-align only when K is already >= 128.
    Kp = _round_up(K, _LANE) if K >= _LANE else _round_up(K, 16)
    Np = _round_up(E, _LANE)          # lane-dense, unmasked output stores
    M16 = _round_up(M, 16)            # sublane-pack safe for bf16 and f32

    # ---- choose tn (embed-dim tile) ------------------------------------------
    tm_floor = min(128, M16)

    def _fits_tn(tn):
        # weight + bias (double-buffered) + xp/out double buffers at tm_floor.
        fixed = 2 * (Kp * tn * b_in + tn * 4)
        stream = 2 * tm_floor * (Kp * b_in + tn * b_out)
        return fixed + stream <= usable

    if max_tile_n is None:
        tn_cap = Np
    else:
        tn_cap = max(_LANE, min(Np, (max_tile_n // _LANE) * _LANE))

    tn = None
    if tn_cap == Np and _fits_tn(Np):
        tn = Np                                   # full weight residency
    else:
        for step in (256, _LANE):                 # prefer 256-aligned N tiles
            c = (tn_cap // step) * step
            while c >= step:
                if Np % c == 0 and _fits_tn(c):
                    tn = c
                    break
                c -= step
            if tn is not None:
                break
        if tn is None:
            tn = _LANE                            # always fits in practice
    n_tiles_n = Np // tn

    # ---- choose tm (patch-row tile) ------------------------------------------
    fixed = 2 * (Kp * tn * b_in + tn * 4)
    per_row = 2 * (Kp * b_in + tn * b_out)
    tm_vmem = max(16, ((usable - fixed) // per_row // 16) * 16)
    if max_tile_m is None:
        max_tile_m = 2048 if vmem_phys > 96 * 1024 * 1024 else 1024
    tm_cap = max(16, min(tm_vmem, max(16, max_tile_m)) // 16 * 16)
    n_tiles_m = pl.cdiv(M16, tm_cap)
    tm = _round_up(pl.cdiv(M16, n_tiles_m), 16)   # minimize M padding
    Mp = tm * n_tiles_m

    working_set = fixed + per_row * tm
    vmem_limit = int(min(budget, max(working_set + 8 * 1024 * 1024,
                                     32 * 1024 * 1024)))

    # ---- grid order ----------------------------------------------------------
    # The operand indexed by the OUTER grid axis is fetched from HBM once; the
    # operand indexed by the INNER axis is re-fetched n_outer times.  Re-read
    # the smaller operand.  (With n_tiles_n == 1 — the common case — the
    # weight's block index is constant, so it is fetched exactly once either
    # way and xp streams through once.)
    m_outer_refetch = n_tiles_m * Kp * Np   # weight re-read if M is outer
    n_outer_refetch = n_tiles_n * Mp * Kp   # xp re-read if N is outer
    m_outer = (n_tiles_n == 1) or (m_outer_refetch <= n_outer_refetch)

    if m_outer:
        grid = (n_tiles_m, n_tiles_n)
        xp_spec = pl.BlockSpec((tm, Kp), lambda m, n: (m, 0))
        w_spec = pl.BlockSpec((Kp, tn), lambda m, n: (0, n))
        bias_spec = pl.BlockSpec((1, tn), lambda m, n: (0, n))
        out_spec = pl.BlockSpec((tm, tn), lambda m, n: (m, n))
    else:
        grid = (n_tiles_n, n_tiles_m)
        xp_spec = pl.BlockSpec((tm, Kp), lambda n, m: (m, 0))
        w_spec = pl.BlockSpec((Kp, tn), lambda n, m: (0, n))
        bias_spec = pl.BlockSpec((1, tn), lambda n, m: (0, n))
        out_spec = pl.BlockSpec((tm, tn), lambda n, m: (m, n))

    # ---- glue: im2col + padding (one fused XLA copy pass) --------------------
    # (B, C, gh, ph, gw, pw) -> (B, gh, gw, C, ph, pw) -> (M, K), (c,kh,kw) order.
    xp = x.reshape(B, C, gh, ph, gw, pw).transpose(0, 2, 4, 1, 3, 5).reshape(M, K)
    xp = jnp.pad(xp.astype(compute_dtype), ((0, Mp - M), (0, Kp - K)))
    # Conv weight (E, C, ph, pw) -> (K, E), same (c, kh, kw) flattening; pad.
    w2d = jnp.pad(weight.reshape(E, K).T.astype(compute_dtype),
                  ((0, Kp - K), (0, Np - E)))
    b2d = jnp.pad(bias.astype(jnp.float32).reshape(1, E), ((0, 0), (0, Np - E)))

    kernel = functools.partial(_proj_kernel, precision=precision)
    out = pl.pallas_call(
        kernel,
        out_shape=jax.ShapeDtypeStruct((Mp, Np), out_dtype),
        grid_spec=pltpu.PrefetchScalarGridSpec(
            num_scalar_prefetch=0,
            grid=grid,
            in_specs=[xp_spec, w_spec, bias_spec],
            out_specs=out_spec,
        ),
        compiler_params=pltpu.CompilerParams(
            dimension_semantics=("parallel", "parallel"),   # megacore-shardable
            vmem_limit_bytes=vmem_limit,
        ),
    )(xp, w2d, b2d)

    # Padded rows hold 0*W + bias and padded cols hold garbage-free zeros+0;
    # both are sliced off here.
    return out[:M, :E].reshape(B, num_patches, E)


if __name__ == "__main__":
    def _reference(x, weight, bias, patch_size):
        ph, pw = patch_size
        y = jax.lax.conv_general_dilated(
            x, weight, window_strides=(ph, pw), padding="VALID",
            dimension_numbers=("NCHW", "OIHW", "NCHW"),
            precision=jax.lax.Precision.HIGHEST)
        y = y + bias[None, :, None, None]
        b_, e_, gh_, gw_ = y.shape
        return y.reshape(b_, e_, gh_ * gw_).transpose(0, 2, 1)

    key = jax.random.PRNGKey(0)

    # ---- Case 1: toy config (img 16x16, patch 4, C=4, E=32), default bf16 feed
    B, C, H, W = 2, 4, 16, 16
    ph = pw = 4
    E = 32
    k1, k2, k3, key = jax.random.split(key, 4)
    x = jax.random.normal(k1, (B, C, H, W), dtype=jnp.float32)
    w = jax.random.normal(k2, (E, C, ph, pw), dtype=jnp.float32) * 0.02
    b = jax.random.normal(k3, (E,), dtype=jnp.float32) * 0.02
    ref = _reference(x, w, b, (ph, pw))

    out = jax.block_until_ready(patch_embed_forward(x, w, b, (ph, pw)))
    assert out.shape == (B, (H // ph) * (W // pw), E), out.shape
    assert out.dtype == x.dtype
    assert jnp.allclose(out, ref, atol=2e-2, rtol=2e-2), "bf16-feed mismatch vs conv"

    # ---- Case 2: explicit f32 MXU feed -> tighter tolerance ------------------
    out_f32 = jax.block_until_ready(
        patch_embed_forward(x, w, b, (ph, pw), compute_dtype=jnp.float32))
    assert jnp.allclose(out_f32, ref, atol=1e-3, rtol=1e-3), "f32 mismatch vs conv"

    # ---- Case 3: bf16 output dtype (halved output HBM write) -----------------
    out_bf = jax.block_until_ready(
        patch_embed_forward(x, w, b, (ph, pw), out_dtype=jnp.bfloat16))
    assert out_bf.dtype == jnp.bfloat16
    assert jnp.allclose(out_bf.astype(jnp.float32), ref, atol=3e-2, rtol=3e-2), \
        "bf16-out mismatch vs conv"

    # ---- Case 4: weight fully resident, 2 M tiles (E=640, max_tile_m=16) -----
    B2, C2, H2, W2 = 2, 3, 16, 16
    p2, E2 = 4, 640
    k1, k2, k3, key = jax.random.split(key, 4)
    x2 = jax.random.normal(k1, (B2, C2, H2, W2), dtype=jnp.float32)
    w2 = jax.random.normal(k2, (E2, C2, p2, p2), dtype=jnp.float32) * 0.02
    b2 = jax.random.normal(k3, (E2,), dtype=jnp.float32) * 0.02
    ref2 = _reference(x2, w2, b2, (p2, p2))

    out2 = jax.block_until_ready(
        patch_embed_forward(x2, w2, b2, (p2, p2), max_tile_m=16))
    assert out2.shape == (B2, (H2 // p2) * (W2 // p2), E2), out2.shape
    assert jnp.allclose(out2, ref2, atol=2e-2, rtol=2e-2), "resident-weight mismatch"

    # ---- Case 5: forced N tiling exercises the fallback grid ordering --------
    out3 = jax.block_until_ready(
        patch_embed_forward(x2, w2, b2, (p2, p2), max_tile_m=16, max_tile_n=128))
    assert jnp.allclose(out3, ref2, atol=2e-2, rtol=2e-2), "N-tiled fallback mismatch"

    print("KERNEL_OK")
</pallas_src>

<mosaic_0001>
module attributes {stable_mosaic.version = 11 : i64} {
  func.func @_proj_kernel(%arg0: i32, %arg1: i32, %arg2: memref<32x64xbf16, #tpu.memory_space<vmem>>, %arg3: memref<64x128xbf16, #tpu.memory_space<vmem>>, %arg4: memref<1x128xf32, #tpu.memory_space<vmem>>, %arg5: memref<32x128xf32, #tpu.memory_space<vmem>>) attributes {dimension_semantics = [#tpu.dimension_semantics<parallel>, #tpu.dimension_semantics<parallel>], iteration_bounds = array<i64: 1, 1>, scalar_prefetch = 0 : i64, scratch_operands = 0 : i64, tpu.core_type = #tpu.core_type<tc>, window_params = [{transform_indices = @transform_0, window_bounds = array<i64: 32, 64>}, {transform_indices = @transform_1, window_bounds = array<i64: 64, 128>}, {transform_indices = @transform_2, window_bounds = array<i64: 1, 128>}, {transform_indices = @transform_3, window_bounds = array<i64: 32, 128>}]} {
    %c0 = arith.constant 0 : index
    %c0_0 = arith.constant 0 : index
    %0 = vector.load %arg2[%c0, %c0_0] : memref<32x64xbf16, #tpu.memory_space<vmem>>, vector<32x64xbf16>
    %c0_1 = arith.constant 0 : index
    %c0_2 = arith.constant 0 : index
    %1 = vector.load %arg3[%c0_1, %c0_2] : memref<64x128xbf16, #tpu.memory_space<vmem>>, vector<64x128xbf16>
    %cst = arith.constant dense<0.000000e+00> : vector<32x128xf32>
    %2 = tpu.matmul %0, %1, %cst {dimension_numbers = #tpu.dot_dimension_numbers<[1], [0], [0], [1], [0, 0, 1, 1], [], []>} : vector<32x64xbf16>, vector<64x128xbf16>, vector<32x128xf32> -> vector<32x128xf32>
    %c0_3 = arith.constant 0 : index
    %c0_4 = arith.constant 0 : index
    %3 = vector.load %arg4[%c0_3, %c0_4] : memref<1x128xf32, #tpu.memory_space<vmem>>, vector<1x128xf32>
    %4 = vector.broadcast %3 : vector<1x128xf32> to vector<32x128xf32>
    %5 = arith.addf %2, %4 : vector<32x128xf32>
    %c0_5 = arith.constant 0 : index
    %c0_6 = arith.constant 0 : index
    %6 = vector.load %arg5[%c0_5, %c0_6] : memref<32x128xf32, #tpu.memory_space<vmem>>, vector<32x128xf32>
    tpu.vector_store %arg5[%c0_5, %c0_6], %5 {strides = array<i32>} : memref<32x128xf32, #tpu.memory_space<vmem>>, vector<32x128xf32>,
    return
  }
  func.func @transform_0(%arg0: i32, %arg1: i32) -> (i32, i32) {
    %c0_i32 = arith.constant 0 : i32
    %c0_i32_0 = arith.constant 0 : i32
    return %arg0, %c0_i32 : i32, i32
  }
  func.func @transform_1(%arg0: i32, %arg1: i32) -> (i32, i32) {
    %c0_i32 = arith.constant 0 : i32
    %c0_i32_0 = arith.constant 0 : i32
    return %c0_i32, %arg1 : i32, i32
  }
  func.func @transform_2(%arg0: i32, %arg1: i32) -> (i32, i32) {
    %c0_i32 = arith.constant 0 : i32
    %c0_i32_0 = arith.constant 0 : i32
    return %c0_i32, %arg1 : i32, i32
  }
  func.func @transform_3(%arg0: i32, %arg1: i32) -> (i32, i32) {
    %c0_i32 = arith.constant 0 : i32
    return %arg0, %arg1 : i32, i32
  }
}

</mosaic_0001>

<bundles_post_ra>
// kernel: tpu_custom_call.1
= control target key start
LH: loop header
LB: loop body
LE: loop exit
PB: predicated region body
PF: predicated region fallthrough
CT: control target
= control target key end

     0   :  { %8 = vsyncpa [#allocation3], 0  ;;  %s353_s0 = inlined_call_operand.hbm [shape: bf16[32,64], index: 0, kind: input, shape index: {}]   ;;  %s354_s1 = inlined_call_operand.hbm [shape: bf16[64,128], index: 1, kind: input, shape index: {}]   ;;  %s355_s2 = inlined_call_operand.vmem [shape: f32[1,128], index: 2, kind: input, shape index: {}]   ;;  %s356_s3 = inlined_call_operand.hbm [shape: f32[32,128], index: 3, kind: output, shape index: {}]  }
   0x1   :  { %9 = vsyncpa [#allocation6], 0 }
   0x2   :  { %10 = vsyncpa [#allocation4], 0  ;;  %s287_s12 = smov [#allocation2]   ;;  %s215_s16 = scalar_lea.hbm %s353_s0, 256 }
   0x3   :  { %s16_s13 = sshll.u32 %s287_s12, 4  ;;  %p216_p0 = scmp.ne.s32.totalorder %s353_s0, %s215_s16  ;;  %s17_s13 = int_to_ptr.vmem [resolvable:$true] %s16_s13 }
   0x4   :  { %p219_p1 = scmp.lt.u32.totalorder %s215_s16, %s353_s0 }
   0x6   :  { %p221_p2 = pnand %p219_p1, %p216_p0 }
   0x8   :  { %224 = shalt.err (!%p221_p2)
}
   0x9   :  { %s225_s21 = scalar_lea.vmem %s17_s13, 256  ;;  %p230_p4 = scmp.lt.s32.totalorder %s17_s13, %s17_s13 }
   0xa   :  { %p226_p3 = scmp.ne.s32.totalorder %s17_s13, %s225_s21  ;;  %p231_p5 = scmp.lt.s32.totalorder %s225_s21, %s225_s21 }
   0xc   :  { %p232_p6 = por %p231_p5, %p230_p4 }
   0xe   :  { %p233_p7 = pnand %p232_p6, %p226_p3 }
  0x10   :  { %236 = shalt.err (!%p233_p7)
}
  0x11   :  { %s288_s22 = smov 64   ;;  %s289_s23 = smov 4  }
  0x12   :  { %22 = dma.hbm_to_vmem [thread:$0]  %s353_s0, 256, %s17_s13, [#allocation3], %s288_s22, %s288_s22, %s289_s23  }
  0x13   :  { %s290_s26 = smov [#allocation5]   ;;  %s237_s30 = scalar_lea.hbm %s354_s1, 512 }
  0x14   :  { %s28_s27 = sshll.u32 %s290_s26, 4  ;;  %p238_p8 = scmp.ne.s32.totalorder %s354_s1, %s237_s30  ;;  %s29_s27 = int_to_ptr.vmem [resolvable:$true] %s28_s27 }
  0x15   :  { %p241_p9 = scmp.lt.u32.totalorder %s237_s30, %s354_s1 }
  0x17   :  { %p243_p10 = pnand %p241_p9, %p238_p8 }
  0x19   :  { %246 = shalt.err (!%p243_p10)
}
  0x1a   :  { %s247_s8 = scalar_lea.vmem %s29_s27, 512  ;;  %p252_p12 = scmp.lt.s32.totalorder %s29_s27, %s29_s27 }
  0x1b   :  { %p248_p11 = scmp.ne.s32.totalorder %s29_s27, %s247_s8  ;;  %p253_p13 = scmp.lt.s32.totalorder %s247_s8, %s247_s8 }
  0x1d   :  { %p254_p0 = por %p253_p13, %p252_p12 }
  0x1f   :  { %p255_p1 = pnand %p254_p0, %p248_p11 }
  0x21   :  { %258 = shalt.err (!%p255_p1)
}
  0x22   :  { %34 = dma.hbm_to_vmem [thread:$0]  %s354_s1, 512, %s29_s27, [#allocation6], %s288_s22, %s288_s22, %s289_s23  }
  0x23   :  { %281 = dma.done.wait [#allocation3], 256  }
  0x24   :  { %282 = vsyncadd [#allocation3], 4294967040 }
  0x25   :  { %283 = dma.done.wait [#allocation6], 512  }
  0x26   :  { %284 = vsyncadd [#allocation6], 4294966784  ;;  %v209_v0 = vld [vmem:[#allocation5] sm:$0xff]   ;;  %v210_v1 = vld [vmem:[#allocation5 + $0x8] sm:$0xff]   ;;  %vm97_vm0 = vcmask 523264   ;;  %s291_s11 = smov [#allocation7]  }
  0x27   :  { %190 = vmatprep.subr.bf16.mxu0 %v209_v0  ;;  %v211_v2 = vld [vmem:[#allocation5 + $0x10] sm:$0xff]   ;;  %v212_v4 = vld [vmem:[#allocation5 + $0x18] sm:$0xff]   ;;  %s162_s12 = sshll.u32 %s291_s11, 4  ;;  %s163_s12 = int_to_ptr.vmem [resolvable:$true] %s162_s12 }
  0x28   :  { %191 = vmatpush3.bf16.msra.mxu0 %v209_v0  ;;  %v213_v3 = vld [vmem:[#allocation2] sm:$0xff]   ;;  %v214_v5 = vld [vmem:[#allocation2 + $0x8] sm:$0xff]   ;;  %s259_s13 = scalar_lea.vmem %s163_s12, 512  ;;  %p264_p3 = scmp.lt.s32.totalorder %s163_s12, %s163_s12 }
  0x29   :  { %192 = vmatprep.subr.bf16.mxu0 %v210_v1  ;;  %198 = vmatprep.mubr.msk.bf16.mxu0 %vm97_vm0, %v213_v3  ;;  %v175_v6 = vld [vmem:[%s355_s2] ss:$0 sm:$0xff]  ;;  %p260_p2 = scmp.ne.s32.totalorder %s163_s12, %s259_s13  ;;  %p265_p4 = scmp.lt.s32.totalorder %s259_s13, %s259_s13 }
  0x2b   :  { %p266_p5 = por %p265_p4, %p264_p3 }
  0x2c   :  { %193 = vmatpush3.bf16.msra.mxu0 %v210_v1 }
  0x2d   :  { %194 = vmatprep.subr.bf16.mxu0 %v211_v2  ;;  %p267_p6 = pnand %p266_p5, %p260_p2 }
  0x30   :  { %195 = vmatpush3.bf16.msra.mxu0 %v211_v2 }
  0x31   :  { %196 = vmatprep.subr.bf16.mxu0 %v212_v4 }
  0x34   :  { %197 = vmatpush3.bf16.msra.mxu0 %v212_v4 }
  0x37   :  { %199 = vmatmul.mubr.msk.bf16.vlgmr.msra.gmra.mrb[0].mxu0 %vm97_vm0, %v214_v5 }
 0x10a   :  { %v200_v7 = vpop.f32.mrb[0].mxu0 }
 0x10b   :  { %v147_v8 = vadd.f32 %v200_v7, %v175_v6  ;;  %v138_v9 = vpop.f32.mrb[1].mxu0 }
 0x10c   :  { %v139_v10 = vadd.f32 %v175_v6, %v138_v9  ;;  %v201_v11 = vpop.f32.mrb[2].mxu0 }
 0x10d   :  { %155 = vst [vmem:[#allocation7 + $0x10] sm:$0xff] %v147_v8  ;;  %v150_v12 = vadd.f32 %v201_v11, %v175_v6  ;;  %v141_v13 = vpop.f32.mrb[3].mxu0 }
 0x10e   :  { %153 = vst [vmem:[#allocation7] sm:$0xff] %v139_v10  ;;  %v142_v14 = vadd.f32 %v175_v6, %v141_v13 }
 0x10f   :  { %156 = vst [vmem:[#allocation7 + $0x18] sm:$0xff] %v150_v12 }
 0x110   :  { %154 = vst [vmem:[#allocation7 + $0x8] sm:$0xff] %v142_v14 }
 0x111   :  { %270 = shalt.err (!%p267_p6)
}
 0x112   :  { %s271_s15 = scalar_lea.hbm %s356_s3, 512 }
 0x113   :  { %p272_p7 = scmp.ne.s32.totalorder %s356_s3, %s271_s15  ;;  %p275_p8 = scmp.lt.u32.totalorder %s271_s15, %s356_s3 }
 0x115   :  { %p277_p9 = pnand %p275_p8, %p272_p7 }
 0x117   :  { %280 = shalt.err (!%p277_p9)
}
 0x118   :  { %s292_s20 = smov 128   ;;  %s293_s21 = smov 8  }
 0x119   :  { %168 = dma.vmem_to_hbm [thread:$0]  %s163_s12, 512, %s356_s3, [#allocation4], %s292_s20, %s292_s20, %s293_s21  }
 0x11a   :  { %285 = dma.done.wait [#allocation4], 512  }
 0x11b   :  { %286 = vsyncadd [#allocation4], 4294966784 }
 0x11c   :  { %172 = vsyncpa [#allocation3], 1 }
 0x11d   :  { %173 = vsyncpa [#allocation6], 1 }
 0x11e   :  { %174 = vsyncpa [#allocation4], 1 }

</bundles_post_ra>
